<compile_context>
chip_gen: v5e
topology: v5e:2x2
jax: 0.10.0
libtpu: 0.0.40
codegen_flags: <defaults>
</compile_context>

<pallas_src>
import jax
import jax.numpy as jnp
from jax.experimental import pallas as pl
from jax.experimental.pallas import tpu as pltpu

_LANE = 128                 # lane width (last dim)
_SUBLANE = 8                # f32 sublane tile (second-to-last dim)
_VMEM_CEILING = 56 << 20    # stay under v7x's 64 MiB per-TensorCore VMEM


def _round_up(n, m):
    return ((n + m - 1) // m) * m


def _make_fused_mlp_kernel(num_layers):
    """refs = (x, w0, b0, ..., w{L-1}, b{L-1}, out).

    x / h stream in bf16; matmul accumulation, bias add, ReLU and log_softmax
    run in f32.  The padded-class mask is baked into the final bias (-1e30
    lanes), so no iota/where is needed inside the kernel.
    """

    def kernel(*refs):
        x_ref = refs[0]
        out_ref = refs[-1]
        wb = refs[1:-1]

        h = x_ref[...]                                   # (tm, D_pad) bf16
        for l in range(num_layers):
            w = wb[2 * l][...]                           # (in_pad, out_pad) bf16
            b = wb[2 * l + 1][...]                       # (1, out_pad) f32
            z = jnp.dot(h, w, preferred_element_type=jnp.float32) + b
            if l < num_layers - 1:
                h = jnp.maximum(z, 0.0).astype(jnp.bfloat16)
                # dropout: identity in eval mode
            else:
                # numerically-stable log_softmax; padded lanes already -1e30
                m = jnp.max(z, axis=-1, keepdims=True)
                s = z - m
                lse = jnp.log(jnp.sum(jnp.exp(s), axis=-1, keepdims=True))
                out_ref[...] = (s - lse).astype(out_ref.dtype)

    return kernel


def classifier_forward(x, params):
    """Fused forward pass. params = [(W, b), ...] with W of shape (in, out)."""
    B, D = x.shape
    num_layers = len(params)
    num_classes = params[-1][0].shape[1]

    D_pad = _round_up(D, _LANE)

    # --- pad weights / biases; bake the class mask into the final bias ------
    padded = []
    for l, (w, b) in enumerate(params):
        fi, fo = w.shape
        fi_p, fo_p = _round_up(fi, _LANE), _round_up(fo, _LANE)
        w_p = jnp.zeros((fi_p, fo_p), jnp.bfloat16).at[:fi, :fo].set(
            w.astype(jnp.bfloat16))
        if l == num_layers - 1:
            # -1e30 (not -inf: avoids -inf - -inf = NaN) masks padded classes;
            # zero-padded weight columns make the matmul contribution exactly 0.
            b_p = jnp.full((1, fo_p), -1e30, jnp.float32).at[:, :fo].set(b)
        else:
            b_p = jnp.zeros((1, fo_p), jnp.float32).at[:, :fo].set(b)
        padded.append((w_p, b_p))
    C_pad = padded[-1][0].shape[1]                       # lane-dense output width

    resident_bytes = sum(w.size * w.dtype.itemsize + b.size * b.dtype.itemsize
                         for w, b in padded)
    act_pad_max = max([D_pad] + [w.shape[1] for w, _ in padded])

    # --- batch tile: biggest tile that fits the VMEM budget; split a
    #     single-step grid in two when possible (v7x has 2 TensorCores) ------
    B_al = _round_up(max(B, 1), _SUBLANE)
    tm = _SUBLANE
    for cand in (1024, 512, 256, 128, 64, 32, 16, 8):
        if cand > B_al:
            continue
        step_bytes = (2 * cand * D_pad * 2        # bf16 x tile, double buffered
                      + 2 * cand * C_pad * 4      # f32 out tile, double buffered
                      + cand * act_pad_max * 6)   # live f32 z + bf16 h
        if resident_bytes + step_bytes <= _VMEM_CEILING:
            tm = cand
            break
    if tm >= B_al and B_al > _SUBLANE:               # grid would be (1,)
        tm = max(_SUBLANE, _round_up((B_al + 1) // 2, _SUBLANE))
    B_pad = _round_up(B_al, tm)
    grid = (B_pad // tm,)

    x_p = jnp.zeros((B_pad, D_pad), jnp.bfloat16).at[:B, :D].set(
        x.astype(jnp.bfloat16))

    # --- explicit scoped-VMEM limit (defaults are 16/32 MiB) ----------------
    step_bytes = (2 * tm * D_pad * 2
                  + 2 * tm * C_pad * 4
                  + tm * act_pad_max * 6)
    need = resident_bytes + step_bytes
    vmem_limit = int(min(_VMEM_CEILING,
                         max(int(need * 1.5) + (1 << 20), 8 << 20)))

    # --- specs: x/out tiled over batch, weights resident (constant index) ---
    def build_specs(single_buffer_weights):
        in_specs = [pl.BlockSpec((tm, D_pad), lambda i: (i, 0))]
        for w_p, b_p in padded:
            if single_buffer_weights:
                in_specs.append(pl.BlockSpec(w_p.shape, lambda i: (0, 0),
                                             pipeline_mode=pl.Buffered(1)))
                in_specs.append(pl.BlockSpec(b_p.shape, lambda i: (0, 0),
                                             pipeline_mode=pl.Buffered(1)))
            else:
                in_specs.append(pl.BlockSpec(w_p.shape, lambda i: (0, 0)))
                in_specs.append(pl.BlockSpec(b_p.shape, lambda i: (0, 0)))
        out_specs = pl.BlockSpec((tm, C_pad), lambda i: (i, 0))
        return in_specs, out_specs

    flat_inputs = [x_p]
    for w_p, b_p in padded:
        flat_inputs.extend([w_p, b_p])

    flops = 2 * B_pad * sum(w.shape[0] * w.shape[1] for w, _ in padded)
    bytes_accessed = (x_p.size * x_p.dtype.itemsize
                      + resident_bytes
                      + B_pad * C_pad * 4)

    kernel = _make_fused_mlp_kernel(num_layers)
    out_shape = jax.ShapeDtypeStruct((B_pad, C_pad), jnp.float32)
    cparams = pltpu.CompilerParams(dimension_semantics=("parallel",),
                                   vmem_limit_bytes=vmem_limit)
    cost = pl.CostEstimate(flops=flops, transcendentals=B_pad * C_pad,
                           bytes_accessed=bytes_accessed)

    def run(single_buffer_weights):
        in_specs, out_specs = build_specs(single_buffer_weights)
        return pl.pallas_call(
            kernel,
            out_shape=out_shape,
            grid=grid,
            in_specs=in_specs,
            out_specs=out_specs,
            compiler_params=cparams,
            cost_estimate=cost,
        )(*flat_inputs)

    try:
        out_padded = run(True)
    except Exception:
        # Fallback if pl.Buffered(1) is not supported by this jax version:
        # identical math, default double-buffered weights.
        out_padded = run(False)

    return out_padded[:B, :num_classes]


def init_classifier_params(key, input_size, hidden_sizes, output_size):
    """Deterministic init (nn.Linear-like bounds); W stored as (in, out)."""
    sizes = [input_size] + list(hidden_sizes) + [output_size]
    params = []
    for fan_in, fan_out in zip(sizes[:-1], sizes[1:]):
        key, kw, kb = jax.random.split(key, 3)
        bound = 1.0 / jnp.sqrt(fan_in)
        w = jax.random.uniform(kw, (fan_in, fan_out), jnp.float32, -bound, bound)
        b = jax.random.uniform(kb, (1, fan_out), jnp.float32, -bound, bound)
        params.append((w, b))
    return params


def _reference_forward(x, params):
    """Pure-JAX reference with the SAME numerics (bf16 matmul, f32 elsewhere)."""
    def mm(h, w):
        return jnp.dot(h.astype(jnp.bfloat16), w.astype(jnp.bfloat16),
                       preferred_element_type=jnp.float32)

    h = x
    for w, b in params[:-1]:
        h = jnp.maximum(mm(h, w) + b, 0.0)
    w, b = params[-1]
    z = mm(h, w) + b
    return jax.nn.log_softmax(z, axis=1)


if __name__ == "__main__":
    key = jax.random.PRNGKey(0)

    input_size = 32
    hidden_sizes = [64, 32]
    output_size = 10

    kx, kx2, kp = jax.random.split(key, 3)
    params = init_classifier_params(kp, input_size, hidden_sizes, output_size)

    # small batch (padded 4 -> 8 rows, single grid step)
    x = jax.random.normal(kx, (4, input_size), dtype=jnp.float32)
    out = jax.block_until_ready(classifier_forward(x, params))
    ref = _reference_forward(x, params)
    assert out.shape == (4, output_size)
    assert jnp.allclose(out, ref, atol=2e-3, rtol=2e-3), \
        "mismatch vs JAX reference (B=4)"

    # batch that exercises the tiled/parallel grid (130 -> padded 256, grid=(2,))
    x2 = jax.random.normal(kx2, (130, input_size), dtype=jnp.float32)
    out2 = jax.block_until_ready(classifier_forward(x2, params))
    ref2 = _reference_forward(x2, params)
    assert out2.shape == (130, output_size)
    assert jnp.allclose(out2, ref2, atol=2e-3, rtol=2e-3), \
        "mismatch vs JAX reference (B=130)"

    print("KERNEL_OK")
</pallas_src>

<mosaic_0001>
module attributes {stable_mosaic.version = 11 : i64} {
  func.func @kernel(%arg0: i32, %arg1: memref<8x128xbf16, #tpu.memory_space<vmem>>, %arg2: memref<128x128xbf16, #tpu.memory_space<vmem>>, %arg3: memref<1x128xf32, #tpu.memory_space<vmem>>, %arg4: memref<128x128xbf16, #tpu.memory_space<vmem>>, %arg5: memref<1x128xf32, #tpu.memory_space<vmem>>, %arg6: memref<128x128xbf16, #tpu.memory_space<vmem>>, %arg7: memref<1x128xf32, #tpu.memory_space<vmem>>, %arg8: memref<8x128xf32, #tpu.memory_space<vmem>>) attributes {dimension_semantics = [#tpu.dimension_semantics<parallel>], iteration_bounds = array<i64: 1>, scalar_prefetch = 0 : i64, scratch_operands = 0 : i64, tpu.core_type = #tpu.core_type<tc>, window_params = [{transform_indices = @transform_0, window_bounds = array<i64: 8, 128>}, {pipeline_mode = #tpu.pipeline_mode<synchronous>, transform_indices = @transform_1, window_bounds = array<i64: 128, 128>}, {pipeline_mode = #tpu.pipeline_mode<synchronous>, transform_indices = @transform_2, window_bounds = array<i64: 1, 128>}, {pipeline_mode = #tpu.pipeline_mode<synchronous>, transform_indices = @transform_3, window_bounds = array<i64: 128, 128>}, {pipeline_mode = #tpu.pipeline_mode<synchronous>, transform_indices = @transform_4, window_bounds = array<i64: 1, 128>}, {pipeline_mode = #tpu.pipeline_mode<synchronous>, transform_indices = @transform_5, window_bounds = array<i64: 128, 128>}, {pipeline_mode = #tpu.pipeline_mode<synchronous>, transform_indices = @transform_6, window_bounds = array<i64: 1, 128>}, {transform_indices = @transform_7, window_bounds = array<i64: 8, 128>}]} {
    %c0 = arith.constant 0 : index
    %c0_0 = arith.constant 0 : index
    %0 = vector.load %arg1[%c0, %c0_0] : memref<8x128xbf16, #tpu.memory_space<vmem>>, vector<8x128xbf16>
    %c0_1 = arith.constant 0 : index
    %c0_2 = arith.constant 0 : index
    %1 = vector.load %arg2[%c0_1, %c0_2] : memref<128x128xbf16, #tpu.memory_space<vmem>>, vector<128x128xbf16>
    %c0_3 = arith.constant 0 : index
    %c0_4 = arith.constant 0 : index
    %2 = vector.load %arg3[%c0_3, %c0_4] : memref<1x128xf32, #tpu.memory_space<vmem>>, vector<1x128xf32>
    %cst = arith.constant dense<0.000000e+00> : vector<8x128xf32>
    %3 = tpu.matmul %0, %1, %cst {dimension_numbers = #tpu.dot_dimension_numbers<[1], [0], [0], [1], [0, 0, 1, 1], [], []>} : vector<8x128xbf16>, vector<128x128xbf16>, vector<8x128xf32> -> vector<8x128xf32>
    %4 = vector.broadcast %2 : vector<1x128xf32> to vector<8x128xf32>
    %5 = arith.addf %3, %4 : vector<8x128xf32>
    %cst_5 = arith.constant 0.000000e+00 : f32
    %6 = vector.broadcast %cst_5 : f32 to vector<8x128xf32>
    %7 = arith.maximumf %5, %6 : vector<8x128xf32>
    %8 = arith.truncf %7 : vector<8x128xf32> to vector<8x128xbf16>
    %c0_6 = arith.constant 0 : index
    %c0_7 = arith.constant 0 : index
    %9 = vector.load %arg4[%c0_6, %c0_7] : memref<128x128xbf16, #tpu.memory_space<vmem>>, vector<128x128xbf16>
    %c0_8 = arith.constant 0 : index
    %c0_9 = arith.constant 0 : index
    %10 = vector.load %arg5[%c0_8, %c0_9] : memref<1x128xf32, #tpu.memory_space<vmem>>, vector<1x128xf32>
    %cst_10 = arith.constant dense<0.000000e+00> : vector<8x128xf32>
    %11 = tpu.matmul %8, %9, %cst_10 {dimension_numbers = #tpu.dot_dimension_numbers<[1], [0], [0], [1], [0, 0, 1, 1], [], []>} : vector<8x128xbf16>, vector<128x128xbf16>, vector<8x128xf32> -> vector<8x128xf32>
    %12 = vector.broadcast %10 : vector<1x128xf32> to vector<8x128xf32>
    %13 = arith.addf %11, %12 : vector<8x128xf32>
    %cst_11 = arith.constant 0.000000e+00 : f32
    %14 = vector.broadcast %cst_11 : f32 to vector<8x128xf32>
    %15 = arith.maximumf %13, %14 : vector<8x128xf32>
    %16 = arith.truncf %15 : vector<8x128xf32> to vector<8x128xbf16>
    %c0_12 = arith.constant 0 : index
    %c0_13 = arith.constant 0 : index
    %17 = vector.load %arg6[%c0_12, %c0_13] : memref<128x128xbf16, #tpu.memory_space<vmem>>, vector<128x128xbf16>
    %c0_14 = arith.constant 0 : index
    %c0_15 = arith.constant 0 : index
    %18 = vector.load %arg7[%c0_14, %c0_15] : memref<1x128xf32, #tpu.memory_space<vmem>>, vector<1x128xf32>
    %cst_16 = arith.constant dense<0.000000e+00> : vector<8x128xf32>
    %19 = tpu.matmul %16, %17, %cst_16 {dimension_numbers = #tpu.dot_dimension_numbers<[1], [0], [0], [1], [0, 0, 1, 1], [], []>} : vector<8x128xbf16>, vector<128x128xbf16>, vector<8x128xf32> -> vector<8x128xf32>
    %20 = vector.broadcast %18 : vector<1x128xf32> to vector<8x128xf32>
    %21 = arith.addf %19, %20 : vector<8x128xf32>
    %cst_17 = arith.constant dense<0xFF800000> : vector<8xf32>
    %22 = vector.multi_reduction <maximumf>, %21, %cst_17 [1] : vector<8x128xf32> to vector<8xf32>
    %23 = vector.shape_cast %22 : vector<8xf32> to vector<8x1xf32>
    %24 = vector.broadcast %23 : vector<8x1xf32> to vector<8x128xf32>
    %25 = arith.subf %21, %24 : vector<8x128xf32>
    %26 = math.exp %25 : vector<8x128xf32>
    %cst_18 = arith.constant dense<0.000000e+00> : vector<8xf32>
    %27 = vector.multi_reduction <add>, %26, %cst_18 [1] : vector<8x128xf32> to vector<8xf32>
    %28 = vector.shape_cast %27 : vector<8xf32> to vector<8x1xf32>
    %29 = math.log %28 : vector<8x1xf32>
    %30 = vector.broadcast %29 : vector<8x1xf32> to vector<8x128xf32>
    %31 = arith.subf %25, %30 : vector<8x128xf32>
    %c0_19 = arith.constant 0 : index
    %c0_20 = arith.constant 0 : index
    %32 = vector.load %arg8[%c0_19, %c0_20] : memref<8x128xf32, #tpu.memory_space<vmem>>, vector<8x128xf32>
    tpu.vector_store %arg8[%c0_19, %c0_20], %31 {strides = array<i32>} : memref<8x128xf32, #tpu.memory_space<vmem>>, vector<8x128xf32>,
    return
  }
  func.func @transform_0(%arg0: i32) -> (i32, i32) {
    %c0_i32 = arith.constant 0 : i32
    %c0_i32_0 = arith.constant 0 : i32
    return %arg0, %c0_i32 : i32, i32
  }
  func.func @transform_1(%arg0: i32) -> (i32, i32) {
    %c0_i32 = arith.constant 0 : i32
    %c0_i32_0 = arith.constant 0 : i32
    %c0_i32_1 = arith.constant 0 : i32
    return %c0_i32, %c0_i32_0 : i32, i32
  }
  func.func @transform_2(%arg0: i32) -> (i32, i32) {
    %c0_i32 = arith.constant 0 : i32
    %c0_i32_0 = arith.constant 0 : i32
    %c0_i32_1 = arith.constant 0 : i32
    return %c0_i32, %c0_i32_0 : i32, i32
  }
  func.func @transform_3(%arg0: i32) -> (i32, i32) {
    %c0_i32 = arith.constant 0 : i32
    %c0_i32_0 = arith.constant 0 : i32
    %c0_i32_1 = arith.constant 0 : i32
    return %c0_i32, %c0_i32_0 : i32, i32
  }
  func.func @transform_4(%arg0: i32) -> (i32, i32) {
    %c0_i32 = arith.constant 0 : i32
    %c0_i32_0 = arith.constant 0 : i32
    %c0_i32_1 = arith.constant 0 : i32
    return %c0_i32, %c0_i32_0 : i32, i32
  }
  func.func @transform_5(%arg0: i32) -> (i32, i32) {
    %c0_i32 = arith.constant 0 : i32
    %c0_i32_0 = arith.constant 0 : i32
    %c0_i32_1 = arith.constant 0 : i32
    return %c0_i32, %c0_i32_0 : i32, i32
  }
  func.func @transform_6(%arg0: i32) -> (i32, i32) {
    %c0_i32 = arith.constant 0 : i32
    %c0_i32_0 = arith.constant 0 : i32
    %c0_i32_1 = arith.constant 0 : i32
    return %c0_i32, %c0_i32_0 : i32, i32
  }
  func.func @transform_7(%arg0: i32) -> (i32, i32) {
    %c0_i32 = arith.constant 0 : i32
    %c0_i32_0 = arith.constant 0 : i32
    return %arg0, %c0_i32 : i32, i32
  }
}

module attributes {stable_mosaic.version = 11 : i64} {
  func.func @kernel(%arg0: i32, %arg1: memref<8x128xbf16, #tpu.memory_space<vmem>>, %arg2: memref<128x128xbf16, #tpu.memory_space<vmem>>, %arg3: memref<1x128xf32, #tpu.memory_space<vmem>>, %arg4: memref<128x128xbf16, #tpu.memory_space<vmem>>, %arg5: memref<1x128xf32, #tpu.memory_space<vmem>>, %arg6: memref<128x128xbf16, #tpu.memory_space<vmem>>, %arg7: memref<1x128xf32, #tpu.memory_space<vmem>>, %arg8: memref<8x128xf32, #tpu.memory_space<vmem>>) attributes {dimension_semantics = [#tpu.dimension_semantics<parallel>], iteration_bounds = array<i64: 1>, scalar_prefetch = 0 : i64, scratch_operands = 0 : i64, tpu.core_type = #tpu.core_type<tc>, window_params = [{transform_indices = @transform_0, window_bounds = array<i64: 8, 128>}, {pipeline_mode = #tpu.pipeline_mode<synchronous>, transform_indices = @transform_1, window_bounds = array<i64: 128, 128>}, {pipeline_mode = #tpu.pipeline_mode<synchronous>, transform_indices = @transform_2, window_bounds = array<i64: 1, 128>}, {pipeline_mode = #tpu.pipeline_mode<synchronous>, transform_indices = @transform_3, window_bounds = array<i64: 128, 128>}, {pipeline_mode = #tpu.pipeline_mode<synchronous>, transform_indices = @transform_4, window_bounds = array<i64: 1, 128>}, {pipeline_mode = #tpu.pipeline_mode<synchronous>, transform_indices = @transform_5, window_bounds = array<i64: 128, 128>}, {pipeline_mode = #tpu.pipeline_mode<synchronous>, transform_indices = @transform_6, window_bounds = array<i64: 1, 128>}, {transform_indices = @transform_7, window_bounds = array<i64: 8, 128>}]} {
    %c0 = arith.constant 0 : index
    %c0_0 = arith.constant 0 : index
    %0 = vector.load %arg1[%c0, %c0_0] : memref<8x128xbf16, #tpu.memory_space<vmem>>, vector<8x128xbf16>
    %c0_1 = arith.constant 0 : index
    %c0_2 = arith.constant 0 : index
    %1 = vector.load %arg2[%c0_1, %c0_2] : memref<128x128xbf16, #tpu.memory_space<vmem>>, vector<128x128xbf16>
    %c0_3 = arith.constant 0 : index
    %c0_4 = arith.constant 0 : index
    %2 = vector.load %arg3[%c0_3, %c0_4] : memref<1x128xf32, #tpu.memory_space<vmem>>, vector<1x128xf32>
    %cst = arith.constant dense<0.000000e+00> : vector<8x128xf32>
    %3 = tpu.matmul %0, %1, %cst {dimension_numbers = #tpu.dot_dimension_numbers<[1], [0], [0], [1], [0, 0, 1, 1], [], []>} : vector<8x128xbf16>, vector<128x128xbf16>, vector<8x128xf32> -> vector<8x128xf32>
    %4 = vector.broadcast %2 : vector<1x128xf32> to vector<8x128xf32>
    %5 = arith.addf %3, %4 : vector<8x128xf32>
    %cst_5 = arith.constant 0.000000e+00 : f32
    %6 = vector.broadcast %cst_5 : f32 to vector<8x128xf32>
    %7 = arith.maximumf %5, %6 : vector<8x128xf32>
    %8 = arith.truncf %7 : vector<8x128xf32> to vector<8x128xbf16>
    %c0_6 = arith.constant 0 : index
    %c0_7 = arith.constant 0 : index
    %9 = vector.load %arg4[%c0_6, %c0_7] : memref<128x128xbf16, #tpu.memory_space<vmem>>, vector<128x128xbf16>
    %c0_8 = arith.constant 0 : index
    %c0_9 = arith.constant 0 : index
    %10 = vector.load %arg5[%c0_8, %c0_9] : memref<1x128xf32, #tpu.memory_space<vmem>>, vector<1x128xf32>
    %cst_10 = arith.constant dense<0.000000e+00> : vector<8x128xf32>
    %11 = tpu.matmul %8, %9, %cst_10 {dimension_numbers = #tpu.dot_dimension_numbers<[1], [0], [0], [1], [0, 0, 1, 1], [], []>} : vector<8x128xbf16>, vector<128x128xbf16>, vector<8x128xf32> -> vector<8x128xf32>
    %12 = vector.broadcast %10 : vector<1x128xf32> to vector<8x128xf32>
    %13 = arith.addf %11, %12 : vector<8x128xf32>
    %cst_11 = arith.constant 0.000000e+00 : f32
    %14 = vector.broadcast %cst_11 : f32 to vector<8x128xf32>
    %15 = arith.maximumf %13, %14 : vector<8x128xf32>
    %16 = arith.truncf %15 : vector<8x128xf32> to vector<8x128xbf16>
    %c0_12 = arith.constant 0 : index
    %c0_13 = arith.constant 0 : index
    %17 = vector.load %arg6[%c0_12, %c0_13] : memref<128x128xbf16, #tpu.memory_space<vmem>>, vector<128x128xbf16>
    %c0_14 = arith.constant 0 : index
    %c0_15 = arith.constant 0 : index
    %18 = vector.load %arg7[%c0_14, %c0_15] : memref<1x128xf32, #tpu.memory_space<vmem>>, vector<1x128xf32>
    %cst_16 = arith.constant dense<0.000000e+00> : vector<8x128xf32>
    %19 = tpu.matmul %16, %17, %cst_16 {dimension_numbers = #tpu.dot_dimension_numbers<[1], [0], [0], [1], [0, 0, 1, 1], [], []>} : vector<8x128xbf16>, vector<128x128xbf16>, vector<8x128xf32> -> vector<8x128xf32>
    %20 = vector.broadcast %18 : vector<1x128xf32> to vector<8x128xf32>
    %21 = arith.addf %19, %20 : vector<8x128xf32>
    %cst_17 = arith.constant dense<0xFF800000> : vector<8xf32>
    %22 = vector.multi_reduction <maximumf>, %21, %cst_17 [1] : vector<8x128xf32> to vector<8xf32>
    %23 = vector.shape_cast %22 : vector<8xf32> to vector<8x1xf32>
    %24 = vector.broadcast %23 : vector<8x1xf32> to vector<8x128xf32>
    %25 = arith.subf %21, %24 : vector<8x128xf32>
    %26 = math.exp %25 : vector<8x128xf32>
    %cst_18 = arith.constant dense<0.000000e+00> : vector<8xf32>
    %27 = vector.multi_reduction <add>, %26, %cst_18 [1] : vector<8x128xf32> to vector<8xf32>
    %28 = vector.shape_cast %27 : vector<8xf32> to vector<8x1xf32>
    %29 = math.log %28 : vector<8x1xf32>
    %30 = vector.broadcast %29 : vector<8x1xf32> to vector<8x128xf32>
    %31 = arith.subf %25, %30 : vector<8x128xf32>
    %c0_19 = arith.constant 0 : index
    %c0_20 = arith.constant 0 : index
    %32 = vector.load %arg8[%c0_19, %c0_20] : memref<8x128xf32, #tpu.memory_space<vmem>>, vector<8x128xf32>
    tpu.vector_store %arg8[%c0_19, %c0_20], %31 {strides = array<i32>} : memref<8x128xf32, #tpu.memory_space<vmem>>, vector<8x128xf32>,
    return
  }
  func.func @transform_0(%arg0: i32) -> (i32, i32) {
    %c0_i32 = arith.constant 0 : i32
    %c0_i32_0 = arith.constant 0 : i32
    return %arg0, %c0_i32 : i32, i32
  }
  func.func @transform_1(%arg0: i32) -> (i32, i32) {
    %c0_i32 = arith.constant 0 : i32
    %c0_i32_0 = arith.constant 0 : i32
    %c0_i32_1 = arith.constant 0 : i32
    return %c0_i32, %c0_i32_0 : i32, i32
  }
  func.func @transform_2(%arg0: i32) -> (i32, i32) {
    %c0_i32 = arith.constant 0 : i32
    %c0_i32_0 = arith.constant 0 : i32
    %c0_i32_1 = arith.constant 0 : i32
    return %c0_i32, %c0_i32_0 : i32, i32
  }
  func.func @transform_3(%arg0: i32) -> (i32, i32) {
    %c0_i32 = arith.constant 0 : i32
    %c0_i32_0 = arith.constant 0 : i32
    %c0_i32_1 = arith.constant 0 : i32
    return %c0_i32, %c0_i32_0 : i32, i32
  }
  func.func @transform_4(%arg0: i32) -> (i32, i32) {
    %c0_i32 = arith.constant 0 : i32
    %c0_i32_0 = arith.constant 0 : i32
    %c0_i32_1 = arith.constant 0 : i32
    return %c0_i32, %c0_i32_0 : i32, i32
  }
  func.func @transform_5(%arg0: i32) -> (i32, i32) {
    %c0_i32 = arith.constant 0 : i32
    %c0_i32_0 = arith.constant 0 : i32
    %c0_i32_1 = arith.constant 0 : i32
    return %c0_i32, %c0_i32_0 : i32, i32
  }
  func.func @transform_6(%arg0: i32) -> (i32, i32) {
    %c0_i32 = arith.constant 0 : i32
    %c0_i32_0 = arith.constant 0 : i32
    %c0_i32_1 = arith.constant 0 : i32
    return %c0_i32, %c0_i32_0 : i32, i32
  }
  func.func @transform_7(%arg0: i32) -> (i32, i32) {
    %c0_i32 = arith.constant 0 : i32
    %c0_i32_0 = arith.constant 0 : i32
    return %arg0, %c0_i32 : i32, i32
  }
}

</mosaic_0001>

<bundles_post_ra>
// kernel: tpu_custom_call.1
= control target key start
LH: loop header
LB: loop body
LE: loop exit
PB: predicated region body
PF: predicated region fallthrough
CT: control target
= control target key end

     0   :  { %12 = vsyncpa [#allocation3], 0  ;;  %s699_s0 = inlined_call_operand.hbm [shape: bf16[8,128], index: 0, kind: input, shape index: {}]   ;;  %s700_s1 = inlined_call_operand.hbm [shape: bf16[128,128], index: 1, kind: input, shape index: {}]   ;;  %s701_s2 = inlined_call_operand.vmem [shape: f32[1,128], index: 2, kind: input, shape index: {}]   ;;  %s702_s3 = inlined_call_operand.hbm [shape: bf16[128,128], index: 3, kind: input, shape index: {}]   ;;  %s703_s4 = inlined_call_operand.vmem [shape: f32[1,128], index: 4, kind: input, shape index: {}]   ;;  %s704_s5 = inlined_call_operand.hbm [shape: bf16[128,128], index: 5, kind: input, shape index: {}]   ;;  %s705_s6 = inlined_call_operand.vmem [shape: f32[1,128], index: 6, kind: input, shape index: {}]   ;;  %s706_s7 = inlined_call_operand.hbm [shape: f32[8,128], index: 7, kind: output, shape index: {}]  }
   0x1   :  { %13 = vsyncpa [#allocation6], 0 }
   0x2   :  { %14 = vsyncpa [#allocation9], 0  ;;  %s31_s26 = sshll.u32 %s700_s1, 4  ;;  %s32_s26 = int_to_ptr.hbm [resolvable:$true] %s31_s26 }
   0x3   :  { %15 = vsyncpa [#allocation4], 0  ;;  %s628_s27 = smov [#allocation5]   ;;  %s21_s8 = sshll.u32 %s699_s0, 4  ;;  %s22_s8 = int_to_ptr.hbm [resolvable:$true] %s21_s8 }
   0x4   :  { %s33_s28 = sshll.u32 %s628_s27, 4  ;;  %s629_s9 = smov 64   ;;  %s34_s28 = int_to_ptr.vmem [resolvable:$true] %s33_s28 }
   0x5   :  { %s630_s10 = smov 4   ;;  %s631_s11 = smov [#allocation2]  }
   0x6   :  { %39 = dma.hbm_to_vmem [thread:$0]  %s32_s26, 1024, %s34_s28, [#allocation6], %s629_s9, %s629_s9, %s630_s10  }
   0x7   :  { %s23_s12 = sshll.u32 %s631_s11, 4  ;;  %s46_s15 = sshll.u32 %s702_s3, 4  ;;  %s24_s12 = int_to_ptr.vmem [resolvable:$true] %s23_s12  ;;  %s47_s15 = int_to_ptr.hbm [resolvable:$true] %s46_s15 }
   0x8   :  { %26 = dma.hbm_to_vmem [thread:$0]  %s22_s8, 64, %s24_s12, [#allocation3]  }
   0x9   :  { %s61_s17 = sshll.u32 %s704_s5, 4  ;;  %s632_s18 = smov [#allocation7]   ;;  %s62_s17 = int_to_ptr.hbm [resolvable:$true] %s61_s17 }
   0xa   :  { %s48_s19 = sshll.u32 %s632_s18, 4  ;;  %s633_s0 = smov [#allocation8]   ;;  %s49_s19 = int_to_ptr.vmem [resolvable:$true] %s48_s19 }
   0xb   :  { %54 = dma.hbm_to_vmem [thread:$0]  %s47_s15, 1024, %s49_s19, [#allocation6], %s629_s9, %s629_s9, %s630_s10  }
   0xc   :  { %s63_s20 = sshll.u32 %s633_s0, 4  ;;  %s64_s20 = int_to_ptr.vmem [resolvable:$true] %s63_s20 }
   0xd   :  { %69 = dma.hbm_to_vmem [thread:$0]  %s62_s17, 1024, %s64_s20, [#allocation9], %s629_s9, %s629_s9, %s630_s10  }
   0xe   :  { %620 = dma.done.wait [#allocation3], 64  }
   0xf   :  { %621 = vsyncadd [#allocation3], 4294967232 }
  0x10   :  { %622 = dma.done.wait [#allocation6], 2048  }
  0x11   :  { %623 = vsyncadd [#allocation6], 4294965248 }
  0x12   :  { %624 = dma.done.wait [#allocation9], 1024  }
  0x13   :  { %625 = vsyncadd [#allocation9], 4294966272  ;;  %v469_v0 = vld [vmem:[#allocation5 + $0x38] sm:$0xff]  ;;  %v468_v1 = vld [vmem:[#allocation5 + $0x30] sm:$0xff]  ;;  %s354_s27 = sshll.u32 %s706_s7, 4  ;;  %s355_s27 = int_to_ptr.hbm [resolvable:$true] %s354_s27 }
  0x14   :  { %157 = vmatpush.bf16.msra.mxu0 %v469_v0  ;;  %v477_v2 = vld [vmem:[#allocation7 + $0x38] sm:$0xff]  ;;  %v476_v3 = vld [vmem:[#allocation7 + $0x30] sm:$0xff]  ;;  %v467_v4 = vld [vmem:[#allocation5 + $0x28] sm:$0xff] }
  0x15   :  { %240 = vmatpush.bf16.msra.mxu1 %v477_v2  ;;  %v475_v5 = vld [vmem:[#allocation7 + $0x28] sm:$0xff]  ;;  %v466_v6 = vld [vmem:[#allocation5 + $0x20] sm:$0xff]  ;;  %v465_v8 = vld [vmem:[#allocation5 + $0x18] sm:$0xff] }
  0x16   :  { %v474_v7 = vld [vmem:[#allocation7 + $0x20] sm:$0xff]  ;;  %v473_v9 = vld [vmem:[#allocation7 + $0x18] sm:$0xff]  ;;  %v464_v10 = vld [vmem:[#allocation5 + $0x10] sm:$0xff] }
  0x17   :  { %v472_v11 = vld [vmem:[#allocation7 + $0x10] sm:$0xff]  ;;  %v463_v12 = vld [vmem:[#allocation5 + $0x8] sm:$0xff]  ;;  %v462_v13 = vld [vmem:[#allocation5] sm:$0xff] }
  0x18   :  { %158 = vmatpush.bf16.msra.mxu0 %v468_v1  ;;  %v88_v14 = vld [vmem:[#allocation2] sm:$0xf]  ;;  %v471_v15 = vld [vmem:[#allocation7 + $0x8] sm:$0xff]  ;;  %v470_v16 = vld [vmem:[#allocation7] sm:$0xff] }
  0x19   :  { %241 = vmatpush.bf16.msra.mxu1 %v476_v3  ;;  %v485_v17 = vld [vmem:[#allocation8 + $0x38] sm:$0xff]  ;;  %v484_v18 = vld [vmem:[#allocation8 + $0x30] sm:$0xff]  ;;  %v483_v19 = vld [vmem:[#allocation8 + $0x28] sm:$0xff] }
  0x1a   :  { %323 = vmatpush.bf16.msra.mxu2 %v485_v17  ;;  %v482_v20 = vld [vmem:[#allocation8 + $0x20] sm:$0xff]  ;;  %v481_v21 = vld [vmem:[#allocation8 + $0x18] sm:$0xff]  ;;  %v480_v22 = vld [vmem:[#allocation8 + $0x10] sm:$0xff] }
  0x1b   :  { %v493_v23 = vld [vmem:[%s701_s2] ss:$0 sm:$0xff]  ;;  %v479_v29 = vld [vmem:[#allocation8 + $0x8] sm:$0xff]  ;;  %v478_v30 = vld [vmem:[#allocation8] sm:$0xff] }
  0x1c   :  { %159 = vmatpush.bf16.msra.mxu0 %v467_v4  ;;  %v494_v31 = vld [vmem:[%s703_s4] ss:$0 sm:$0xff]  ;;  %s634_s4 = smov [#allocation10]  }
  0x1d   :  { %242 = vmatpush.bf16.msra.mxu1 %v475_v5  ;;  %v495_v37 = vld [vmem:[%s705_s6] ss:$0 sm:$0xff]  ;;  %s352_s24 = sshll.u32 %s634_s4, 4  ;;  %s353_s24 = int_to_ptr.vmem [resolvable:$true] %s352_s24 }
  0x1e   :  { %324 = vmatpush.bf16.msra.mxu2 %v484_v18 }
  0x20   :  { %160 = vmatpush.bf16.msra.mxu0 %v466_v6 }
  0x21   :  { %243 = vmatpush.bf16.msra.mxu1 %v474_v7 }
  0x22   :  { %325 = vmatpush.bf16.msra.mxu2 %v483_v19 }
  0x24   :  { %161 = vmatpush.bf16.msra.mxu0 %v465_v8 }
  0x25   :  { %244 = vmatpush.bf16.msra.mxu1 %v473_v9 }
  0x26   :  { %326 = vmatpush.bf16.msra.mxu2 %v482_v20 }
  0x28   :  { %162 = vmatpush.bf16.msra.mxu0 %v464_v10 }
  0x29   :  { %245 = vmatpush.bf16.msra.mxu1 %v472_v11 }
  0x2a   :  { %327 = vmatpush.bf16.msra.mxu2 %v481_v21 }
  0x2c   :  { %163 = vmatpush.bf16.msra.mxu0 %v463_v12 }
  0x2d   :  { %246 = vmatpush.bf16.msra.mxu1 %v471_v15 }
  0x2e   :  { %328 = vmatpush.bf16.msra.mxu2 %v480_v22 }
  0x30   :  { %164 = vmatpush.bf16.msra.mxu0 %v462_v13 }
  0x31   :  { %247 = vmatpush.bf16.msra.mxu1 %v470_v16 }
  0x32   :  { %329 = vmatpush.bf16.msra.mxu2 %v479_v29 }
  0x33   :  { %165 = vmatmul.bf16.vlgmr.msra.gmra.mxu0 %v88_v14 }
  0x36   :  { %330 = vmatpush.bf16.msra.mxu2 %v478_v30 }
  0xb0   :  { %v166_v24 = vpop.f32.mrf.mxu0 }
  0xb1   :  { %v167_v25 = vadd.f32 %v493_v23, %v166_v24 }
  0xb3   :  { %v170_v26 = vmax.f32 %v167_v25, 0.0 }
  0xb5   :  { %v171_v27 = vpack.c.bf16 %v170_v26, %v170_v26 }
  0xb7   :  { %248 = vmatmul.bf16.vlgmr.msra.gmra.mxu1 %v171_v27 }
  0xb8   :  { %v168_v28 = vpop.f32.mrf.mxu0 }
 0x134   :  { %v249_v32 = vpop.f32.mrf.mxu1 }
 0x135   :  { %v250_v33 = vadd.f32 %v494_v31, %v249_v32 }
 0x137   :  { %v253_v34 = vmax.f32 %v250_v33, 0.0 }
 0x139   :  { %v254_v35 = vpack.c.bf16 %v253_v34, %v253_v34 }
 0x13b   :  { %331 = vmatmul.bf16.vlgmr.msra.gmra.mxu2 %v254_v35 }
 0x13c   :  { %v251_v36 = vpop.f32.mrf.mxu1 }
 0x1be   :  { %v332_v38 = vpop.f32.mrf.mxu2 }
 0x1bf   :  { %v333_v39 = vadd.f32 %v495_v37, %v332_v38 }
 0x1c1   :  { %336 = vmax.xlane.f32.xlu0 %v333_v39 }
 0x1c6   :  { %v334_v40 = vpop.f32.mrf.mxu2 }
 0x234   :  { %v337_v41 = vpop.xlane.xlu0 %336 }
 0x235   :  { %v338_v42 = vsub.f32 %v333_v39, %v337_v41 }
 0x237   :  { %v339_v43 = vmul.f32 1.442695, %v338_v42 }
 0x239   :  { %496 = vpow2.f32 %v339_v43 }
 0x23f   :  { %v497_v44 = vpop.eup %496 }
 0x240   :  { %341 = vadd.xlane.f32.xlu0 %v497_v44 }
 0x2b3   :  { %v342_v45 = vpop.xlane.xlu0 %341 }
 0x2b4   :  { %498 = vlog2.f32 %v342_v45 }
 0x2ba   :  { %v499_v46 = vpop.eup %498 }
 0x2bb   :  { %v344_v47 = vmul.f32 0.6931472, %v499_v46 }
 0x2bd   :  { %v345_v48 = vsub.f32 %v338_v42, %v344_v47 }
 0x2bf   :  { %346 = vst [vmem:[#allocation10] sm:$0xff] %v345_v48 }
 0x2c0   :  { %357 = dma.vmem_to_hbm [thread:$0]  %s353_s24, 128, %s355_s27, [#allocation4]  }
 0x2c1   :  { %626 = dma.done.wait [#allocation4], 128  }
 0x2c2   :  { %627 = vsyncadd [#allocation4], 4294967168 }
 0x2c3   :  { %362 = vsyncpa [#allocation3], 1 }
 0x2c4   :  { %363 = vsyncpa [#allocation6], 1 }
 0x2c5   :  { %364 = vsyncpa [#allocation9], 1 }
 0x2c6   :  { %365 = vsyncpa [#allocation4], 1 }

// kernel: tpu_custom_call.1
= control target key start
LH: loop header
LB: loop body
LE: loop exit
PB: predicated region body
PF: predicated region fallthrough
CT: control target
= control target key end

     0   :  { %12 = vsyncpa [#allocation3], 0  ;;  %s699_s0 = inlined_call_operand.hbm [shape: bf16[8,128], index: 0, kind: input, shape index: {}]   ;;  %s700_s1 = inlined_call_operand.hbm [shape: bf16[128,128], index: 1, kind: input, shape index: {}]   ;;  %s701_s2 = inlined_call_operand.vmem [shape: f32[1,128], index: 2, kind: input, shape index: {}]   ;;  %s702_s3 = inlined_call_operand.hbm [shape: bf16[128,128], index: 3, kind: input, shape index: {}]   ;;  %s703_s4 = inlined_call_operand.vmem [shape: f32[1,128], index: 4, kind: input, shape index: {}]   ;;  %s704_s5 = inlined_call_operand.hbm [shape: bf16[128,128], index: 5, kind: input, shape index: {}]   ;;  %s705_s6 = inlined_call_operand.vmem [shape: f32[1,128], index: 6, kind: input, shape index: {}]   ;;  %s706_s7 = inlined_call_operand.hbm [shape: f32[8,128], index: 7, kind: output, shape index: {}]  }
   0x1   :  { %13 = vsyncpa [#allocation6], 0 }
   0x2   :  { %14 = vsyncpa [#allocation9], 0  ;;  %s31_s26 = sshll.u32 %s700_s1, 4  ;;  %s32_s26 = int_to_ptr.hbm [resolvable:$true] %s31_s26 }
   0x3   :  { %15 = vsyncpa [#allocation4], 0  ;;  %s628_s27 = smov [#allocation5]   ;;  %s21_s8 = sshll.u32 %s699_s0, 4  ;;  %s22_s8 = int_to_ptr.hbm [resolvable:$true] %s21_s8 }
   0x4   :  { %s33_s28 = sshll.u32 %s628_s27, 4  ;;  %s629_s9 = smov 64   ;;  %s34_s28 = int_to_ptr.vmem [resolvable:$true] %s33_s28 }
   0x5   :  { %s630_s10 = smov 4   ;;  %s631_s11 = smov [#allocation2]  }
   0x6   :  { %39 = dma.hbm_to_vmem [thread:$0]  %s32_s26, 1024, %s34_s28, [#allocation6], %s629_s9, %s629_s9, %s630_s10  }
   0x7   :  { %s23_s12 = sshll.u32 %s631_s11, 4  ;;  %s46_s15 = sshll.u32 %s702_s3, 4  ;;  %s24_s12 = int_to_ptr.vmem [resolvable:$true] %s23_s12  ;;  %s47_s15 = int_to_ptr.hbm [resolvable:$true] %s46_s15 }
   0x8   :  { %26 = dma.hbm_to_vmem [thread:$0]  %s22_s8, 64, %s24_s12, [#allocation3]  }
   0x9   :  { %s61_s17 = sshll.u32 %s704_s5, 4  ;;  %s632_s18 = smov [#allocation7]   ;;  %s62_s17 = int_to_ptr.hbm [resolvable:$true] %s61_s17 }
   0xa   :  { %s48_s19 = sshll.u32 %s632_s18, 4  ;;  %s633_s0 = smov [#allocation8]   ;;  %s49_s19 = int_to_ptr.vmem [resolvable:$true] %s48_s19 }
   0xb   :  { %54 = dma.hbm_to_vmem [thread:$0]  %s47_s15, 1024, %s49_s19, [#allocation6], %s629_s9, %s629_s9, %s630_s10  }
   0xc   :  { %s63_s20 = sshll.u32 %s633_s0, 4  ;;  %s64_s20 = int_to_ptr.vmem [resolvable:$true] %s63_s20 }
   0xd   :  { %69 = dma.hbm_to_vmem [thread:$0]  %s62_s17, 1024, %s64_s20, [#allocation9], %s629_s9, %s629_s9, %s630_s10  }
   0xe   :  { %620 = dma.done.wait [#allocation3], 64  }
   0xf   :  { %621 = vsyncadd [#allocation3], 4294967232 }
  0x10   :  { %622 = dma.done.wait [#allocation6], 2048  }
  0x11   :  { %623 = vsyncadd [#allocation6], 4294965248 }
  0x12   :  { %624 = dma.done.wait [#allocation9], 1024  }
  0x13   :  { %625 = vsyncadd [#allocation9], 4294966272  ;;  %v469_v0 = vld [vmem:[#allocation5 + $0x38] sm:$0xff]  ;;  %v468_v1 = vld [vmem:[#allocation5 + $0x30] sm:$0xff]  ;;  %s354_s27 = sshll.u32 %s706_s7, 4  ;;  %s355_s27 = int_to_ptr.hbm [resolvable:$true] %s354_s27 }
  0x14   :  { %157 = vmatpush.bf16.msra.mxu0 %v469_v0  ;;  %v477_v2 = vld [vmem:[#allocation7 + $0x38] sm:$0xff]  ;;  %v476_v3 = vld [vmem:[#allocation7 + $0x30] sm:$0xff]  ;;  %v467_v4 = vld [vmem:[#allocation5 + $0x28] sm:$0xff] }
  0x15   :  { %240 = vmatpush.bf16.msra.mxu1 %v477_v2  ;;  %v475_v5 = vld [vmem:[#allocation7 + $0x28] sm:$0xff]  ;;  %v466_v6 = vld [vmem:[#allocation5 + $0x20] sm:$0xff]  ;;  %v465_v8 = vld [vmem:[#allocation5 + $0x18] sm:$0xff] }
  0x16   :  { %v474_v7 = vld [vmem:[#allocation7 + $0x20] sm:$0xff]  ;;  %v473_v9 = vld [vmem:[#allocation7 + $0x18] sm:$0xff]  ;;  %v464_v10 = vld [vmem:[#allocation5 + $0x10] sm:$0xff] }
  0x17   :  { %v472_v11 = vld [vmem:[#allocation7 + $0x10] sm:$0xff]  ;;  %v463_v12 = vld [vmem:[#allocation5 + $0x8] sm:$0xff]  ;;  %v462_v13 = vld [vmem:[#allocation5] sm:$0xff] }
  0x18   :  { %158 = vmatpush.bf16.msra.mxu0 %v468_v1  ;;  %v88_v14 = vld [vmem:[#allocation2] sm:$0xf]  ;;  %v471_v15 = vld [vmem:[#allocation7 + $0x8] sm:$0xff]  ;;  %v470_v16 = vld [vmem:[#allocation7] sm:$0xff] }
  0x19   :  { %241 = vmatpush.bf16.msra.mxu1 %v476_v3  ;;  %v485_v17 = vld [vmem:[#allocation8 + $0x38] sm:$0xff]  ;;  %v484_v18 = vld [vmem:[#allocation8 + $0x30] sm:$0xff]  ;;  %v483_v19 = vld [vmem:[#allocation8 + $0x28] sm:$0xff] }
  0x1a   :  { %323 = vmatpush.bf16.msra.mxu2 %v485_v17  ;;  %v482_v20 = vld [vmem:[#allocation8 + $0x20] sm:$0xff]  ;;  %v481_v21 = vld [vmem:[#allocation8 + $0x18] sm:$0xff]  ;;  %v480_v22 = vld [vmem:[#allocation8 + $0x10] sm:$0xff] }
  0x1b   :  { %v493_v23 = vld [vmem:[%s701_s2] ss:$0 sm:$0xff]  ;;  %v479_v29 = vld [vmem:[#allocation8 + $0x8] sm:$0xff]  ;;  %v478_v30 = vld [vmem:[#allocation8] sm:$0xff] }
  0x1c   :  { %159 = vmatpush.bf16.msra.mxu0 %v467_v4  ;;  %v494_v31 = vld [vmem:[%s703_s4] ss:$0 sm:$0xff]  ;;  %s634_s4 = smov [#allocation10]  }
  0x1d   :  { %242 = vmatpush.bf16.msra.mxu1 %v475_v5  ;;  %v495_v37 = vld [vmem:[%s705_s6] ss:$0 sm:$0xff]  ;;  %s352_s24 = sshll.u32 %s634_s4, 4  ;;  %s353_s24 = int_to_ptr.vmem [resolvable:$true] %s352_s24 }
  0x1e   :  { %324 = vmatpush.bf16.msra.mxu2 %v484_v18 }
  0x20   :  { %160 = vmatpush.bf16.msra.mxu0 %v466_v6 }
  0x21   :  { %243 = vmatpush.bf16.msra.mxu1 %v474_v7 }
  0x22   :  { %325 = vmatpush.bf16.msra.mxu2 %v483_v19 }
  0x24   :  { %161 = vmatpush.bf16.msra.mxu0 %v465_v8 }
  0x25   :  { %244 = vmatpush.bf16.msra.mxu1 %v473_v9 }
  0x26   :  { %326 = vmatpush.bf16.msra.mxu2 %v482_v20 }
  0x28   :  { %162 = vmatpush.bf16.msra.mxu0 %v464_v10 }
  0x29   :  { %245 = vmatpush.bf16.msra.mxu1 %v472_v11 }
  0x2a   :  { %327 = vmatpush.bf16.msra.mxu2 %v481_v21 }
  0x2c   :  { %163 = vmatpush.bf16.msra.mxu0 %v463_v12 }
  0x2d   :  { %246 = vmatpush.bf16.msra.mxu1 %v471_v15 }
  0x2e   :  { %328 = vmatpush.bf16.msra.mxu2 %v480_v22 }
  0x30   :  { %164 = vmatpush.bf16.msra.mxu0 %v462_v13 }
  0x31   :  { %247 = vmatpush.bf16.msra.mxu1 %v470_v16 }
  0x32   :  { %329 = vmatpush.bf16.msra.mxu2 %v479_v29 }
  0x33   :  { %165 = vmatmul.bf16.vlgmr.msra.gmra.mxu0 %v88_v14 }
  0x36   :  { %330 = vmatpush.bf16.msra.mxu2 %v478_v30 }
  0xb0   :  { %v166_v24 = vpop.f32.mrf.mxu0 }
  0xb1   :  { %v167_v25 = vadd.f32 %v493_v23, %v166_v24 }
  0xb3   :  { %v170_v26 = vmax.f32 %v167_v25, 0.0 }
  0xb5   :  { %v171_v27 = vpack.c.bf16 %v170_v26, %v170_v26 }
  0xb7   :  { %248 = vmatmul.bf16.vlgmr.msra.gmra.mxu1 %v171_v27 }
  0xb8   :  { %v168_v28 = vpop.f32.mrf.mxu0 }
 0x134   :  { %v249_v32 = vpop.f32.mrf.mxu1 }
 0x135   :  { %v250_v33 = vadd.f32 %v494_v31, %v249_v32 }
 0x137   :  { %v253_v34 = vmax.f32 %v250_v33, 0.0 }
 0x139   :  { %v254_v35 = vpack.c.bf16 %v253_v34, %v253_v34 }
 0x13b   :  { %331 = vmatmul.bf16.vlgmr.msra.gmra.mxu2 %v254_v35 }
 0x13c   :  { %v251_v36 = vpop.f32.mrf.mxu1 }
 0x1be   :  { %v332_v38 = vpop.f32.mrf.mxu2 }
 0x1bf   :  { %v333_v39 = vadd.f32 %v495_v37, %v332_v38 }
 0x1c1   :  { %336 = vmax.xlane.f32.xlu0 %v333_v39 }
 0x1c6   :  { %v334_v40 = vpop.f32.mrf.mxu2 }
 0x234   :  { %v337_v41 = vpop.xlane.xlu0 %336 }
 0x235   :  { %v338_v42 = vsub.f32 %v333_v39, %v337_v41 }
 0x237   :  { %v339_v43 = vmul.f32 1.442695, %v338_v42 }
 0x239   :  { %496 = vpow2.f32 %v339_v43 }
 0x23f   :  { %v497_v44 = vpop.eup %496 }
 0x240   :  { %341 = vadd.xlane.f32.xlu0 %v497_v44 }
 0x2b3   :  { %v342_v45 = vpop.xlane.xlu0 %341 }
 0x2b4   :  { %498 = vlog2.f32 %v342_v45 }
 0x2ba   :  { %v499_v46 = vpop.eup %498 }
 0x2bb   :  { %v344_v47 = vmul.f32 0.6931472, %v499_v46 }
 0x2bd   :  { %v345_v48 = vsub.f32 %v338_v42, %v344_v47 }
 0x2bf   :  { %346 = vst [vmem:[#allocation10] sm:$0xff] %v345_v48 }
 0x2c0   :  { %357 = dma.vmem_to_hbm [thread:$0]  %s353_s24, 128, %s355_s27, [#allocation4]  }
 0x2c1   :  { %626 = dma.done.wait [#allocation4], 128  }
 0x2c2   :  { %627 = vsyncadd [#allocation4], 4294967168 }
 0x2c3   :  { %362 = vsyncpa [#allocation3], 1 }
 0x2c4   :  { %363 = vsyncpa [#allocation6], 1 }
 0x2c5   :  { %364 = vsyncpa [#allocation9], 1 }
 0x2c6   :  { %365 = vsyncpa [#allocation4], 1 }

</bundles_post_ra>
